<compile_context>
chip_gen: v7x
topology: tpu7x:2x2x1
jax: 0.10.0
libtpu: 0.0.40
codegen_flags: <defaults>
</compile_context>

<pallas_src>
import jax
import jax.numpy as jnp
from jax.experimental import pallas as pl
from jax.experimental.pallas import tpu as pltpu


D = 11  # feature dim fixed by the module's W / Q shapes


def quadratic_kernel(xt_ref, wcol_ref, q_ref, b_ref, o_ref):
    """out[0, i] = b + sum_j Xt[j, i] * ((Q @ Xt)[j, i] + W[0, j])."""
    xt = xt_ref[...]                                        # (D, TILE_N) f32
    # Tiny MXU matmul; the linear term is folded in by adding the (D, 1)
    # W column (broadcast over lanes).
    t = jnp.dot(q_ref[...], xt,
                preferred_element_type=jnp.float32) + wcol_ref[...]
    # Reduction over D done on the MXU (ones-matvec), not the XLU.  Result is
    # already a lane-dense (1, TILE_N) row -> unmasked vector stores.
    ones_row = jnp.ones((1, xt.shape[0]), dtype=jnp.float32)
    o_ref[...] = (jnp.dot(ones_row, xt * t,
                          preferred_element_type=jnp.float32) + b_ref[0, 0])


def _quadratic_xla(x, w, q, b):
    # Plain fused-XLA path; beats any kernel launch for small N.
    quad = jnp.sum((x @ q) * x, axis=1)
    return (b + w @ x.T + quad[None, :]).astype(jnp.float32)


def quadratic_forward(x, w, q, b, tile_n=8192, min_kernel_n=4096):
    n, d = x.shape

    if n < min_kernel_n:
        # Kernel launch + a single padded tile costs ~1 us; for small N the
        # whole computation is cheaper than that, so let XLA fuse it.
        return _quadratic_xla(x.astype(jnp.float32), w.astype(jnp.float32),
                              q.astype(jnp.float32), jnp.float32(b))

    # Lane-dense (D, N) layout: N sits on the 128-lane axis.
    xt = jnp.transpose(x.astype(jnp.float32))               # (D, N)
    wcol = jnp.reshape(w.astype(jnp.float32), (d, 1))       # W^T column
    qm = q.astype(jnp.float32)
    b2d = jnp.reshape(jnp.asarray(b, dtype=jnp.float32), (1, 1))

    # Lane-dense tile: multiple of 128, but no bigger than needed for small N.
    tile_n = min(tile_n, max(128, pl.cdiv(n, 128) * 128))
    grid = (pl.cdiv(n, tile_n),)

    return pl.pallas_call(
        quadratic_kernel,
        out_shape=jax.ShapeDtypeStruct((1, n), jnp.float32),
        grid=grid,
        in_specs=[
            # Xt tiles stream over N (lanes); D=11 is the full sublane extent.
            pl.BlockSpec((d, tile_n), lambda i: (0, i)),
            # W column and Q are tiny, constant-indexed -> stay resident.
            pl.BlockSpec((d, 1), lambda i: (0, 0)),
            pl.BlockSpec((d, d), lambda i: (0, 0)),
            # Scalar bias lives in SMEM.
            pl.BlockSpec(memory_space=pltpu.MemorySpace.SMEM),
        ],
        out_specs=pl.BlockSpec((1, tile_n), lambda i: (0, i)),
        compiler_params=pltpu.CompilerParams(
            dimension_semantics=("parallel",)),
    )(xt, wcol, qm, b2d)


def _make_params():
    b = jnp.float32(-0.0906)
    w = jnp.array([[0.0335, 0.1836, 0.201, 0.3206, 0.149, -0.0064, -0.3185,
                    -0.1422, -0.0207, -0.0216, -0.0763]], dtype=jnp.float32)
    q = jnp.array(
        [[-0.040944, 0.020122, 0.00087684, 0.00015676, 0.017145, -0.030407,
          0.014269, 0.012964, -0.0079995, -0.0029237, -0.0072917],
         [0.020426, 0.0043515, 0.00416, -0.014977, -0.027929, -0.0044473,
          0.030062, 0.0060947, 0.01122, -0.027037, 0.015781],
         [-0.00021417, -0.006416, 0.015398, 0.13346, -0.18155, 0.033097,
          -0.0024173, 0.042235, -0.019313, 0.0082293, -0.0020883],
         [0.00027649, 0.026325, -0.11239, 0.038708, -0.031324, 0.024045,
          -0.027013, 0.0021834, 0.011414, 0.0088395, 0.03353],
         [0.016431, 0.063874, 0.12963, -0.028082, 0.033065, -0.020117,
          -0.017458, 0.01781, 0.011791, -0.0040892, -0.035256],
         [-0.030381, 0.0029224, -0.020965, 0.00039679, -0.0085728, 0.028275,
          0.0077793, -0.026672, -0.029451, 0.0019268, -0.0038786],
         [0.014236, -0.012413, 0.019493, -0.011779, -0.011692, 0.0057876,
          0.042145, -0.0084391, -0.028751, 0.011688, -0.00085683],
         [0.012923, -0.0086956, -0.055679, 0.0040601, 0.022269, -0.025586,
          -0.006752, -0.0066175, 0.030278, -0.0088328, 0.016301],
         [-0.0079995, 0.011455, -0.015767, 0.011443, 0.012025, -0.029452,
          -0.02875, 0.030279, -0.058731, 0.022674, -0.041721],
         [-0.0029409, -0.029604, 0.013385, 0.006196, -0.008021, 0.0014607,
          0.013863, -0.0078828, 0.022671, -0.044016, 0.044512],
         [-0.0072917, 0.01529, -0.0064066, 0.033704, -0.035001, -0.0038808,
          -0.00091356, 0.016326, -0.041721, 0.044501, -0.042902]],
        dtype=jnp.float32)
    return w, q, b


def _reference(x, w, q, b):
    lin = w @ x.T                                   # (1, N)
    quad = jnp.sum((x @ q) * x, axis=1)             # (N,)
    return b + lin + quad[None, :]                  # (1, N)


if __name__ == "__main__":
    w, q, b = _make_params()
    key = jax.random.PRNGKey(0)

    # N=8: tiny spec-like case (single padded tile).
    # N=200: partial remainder tile.
    # N=1024: multiple lane-dense tiles (exercises the pipelined grid).
    for n in (8, 200, 1024):
        key, sub = jax.random.split(key)
        x = jax.random.normal(sub, (n, D), dtype=jnp.float32)

        # min_kernel_n=0 forces the Pallas path even at these small demo sizes.
        out = jax.block_until_ready(
            quadratic_forward(x, w, q, b, tile_n=512, min_kernel_n=0))
        ref = _reference(x, w, q, b)

        assert out.shape == (1, n), out.shape
        assert jnp.allclose(out, ref, atol=1e-5, rtol=1e-5), f"mismatch N={n}"

    # Also sanity-check the small-N XLA fallback path once.
    key, sub = jax.random.split(key)
    x = jax.random.normal(sub, (64, D), dtype=jnp.float32)
    out_fb = jax.block_until_ready(quadratic_forward(x, w, q, b))
    assert jnp.allclose(out_fb, _reference(x, w, q, b), atol=1e-5, rtol=1e-5)

    print("KERNEL_OK")
</pallas_src>

<mosaic_0001>
module attributes {stable_mosaic.version = 11 : i64} {
  func.func @quadratic_kernel(%arg0: i32, %arg1: memref<11x128xf32, #tpu.memory_space<vmem>>, %arg2: memref<11x1xf32, #tpu.memory_space<vmem>>, %arg3: memref<11x11xf32, #tpu.memory_space<vmem>>, %arg4: memref<1x1xf32, #tpu.memory_space<smem>>, %arg5: memref<1x128xf32, #tpu.memory_space<vmem>>) attributes {dimension_semantics = [#tpu.dimension_semantics<parallel>], iteration_bounds = array<i64: 1>, scalar_prefetch = 0 : i64, scratch_operands = 0 : i64, tpu.core_type = #tpu.core_type<tc>, window_params = [{transform_indices = @transform_0, window_bounds = array<i64: 11, 128>}, {pipeline_mode = #tpu.pipeline_mode<synchronous>, transform_indices = @transform_1, window_bounds = array<i64: 11, 1>}, {pipeline_mode = #tpu.pipeline_mode<synchronous>, transform_indices = @transform_2, window_bounds = array<i64: 11, 11>}, {transform_indices = @transform_3, window_bounds = array<i64: 1, 1>}, {transform_indices = @transform_4, window_bounds = array<i64: 1, 128>}]} {
    %c0 = arith.constant 0 : index
    %c0_0 = arith.constant 0 : index
    %0 = vector.load %arg1[%c0, %c0_0] : memref<11x128xf32, #tpu.memory_space<vmem>>, vector<11x128xf32>
    %c0_1 = arith.constant 0 : index
    %c0_2 = arith.constant 0 : index
    %1 = vector.load %arg3[%c0_1, %c0_2] : memref<11x11xf32, #tpu.memory_space<vmem>>, vector<11x11xf32>
    %cst = arith.constant dense<0.000000e+00> : vector<11x128xf32>
    %2 = tpu.matmul %1, %0, %cst {dimension_numbers = #tpu.dot_dimension_numbers<[1], [0], [0], [1], [0, 0, 1, 1], [], []>} : vector<11x11xf32>, vector<11x128xf32>, vector<11x128xf32> -> vector<11x128xf32>
    %c0_3 = arith.constant 0 : index
    %c0_4 = arith.constant 0 : index
    %3 = vector.load %arg2[%c0_3, %c0_4] : memref<11x1xf32, #tpu.memory_space<vmem>>, vector<11x1xf32>
    %4 = vector.broadcast %3 : vector<11x1xf32> to vector<11x128xf32>
    %5 = arith.addf %2, %4 : vector<11x128xf32>
    %cst_5 = arith.constant 1.000000e+00 : f32
    %6 = vector.broadcast %cst_5 : f32 to vector<1x11xf32>
    %7 = arith.mulf %0, %5 : vector<11x128xf32>
    %cst_6 = arith.constant dense<0.000000e+00> : vector<1x128xf32>
    %8 = tpu.matmul %6, %7, %cst_6 {dimension_numbers = #tpu.dot_dimension_numbers<[1], [0], [0], [1], [0, 0, 1, 1], [], []>} : vector<1x11xf32>, vector<11x128xf32>, vector<1x128xf32> -> vector<1x128xf32>
    %c0_7 = arith.constant 0 : index
    %c0_8 = arith.constant 0 : index
    %9 = memref.load %arg4[%c0_7, %c0_8] : memref<1x1xf32, #tpu.memory_space<smem>>
    %10 = vector.broadcast %9 : f32 to vector<1x128xf32>
    %11 = arith.addf %8, %10 : vector<1x128xf32>
    %c0_9 = arith.constant 0 : index
    %c0_10 = arith.constant 0 : index
    %12 = vector.load %arg5[%c0_9, %c0_10] : memref<1x128xf32, #tpu.memory_space<vmem>>, vector<1x128xf32>
    tpu.vector_store %arg5[%c0_9, %c0_10], %11 {strides = array<i32>} : memref<1x128xf32, #tpu.memory_space<vmem>>, vector<1x128xf32>,
    return
  }
  func.func @transform_0(%arg0: i32) -> (i32, i32) {
    %c0_i32 = arith.constant 0 : i32
    %c0_i32_0 = arith.constant 0 : i32
    return %c0_i32, %arg0 : i32, i32
  }
  func.func @transform_1(%arg0: i32) -> (i32, i32) {
    %c0_i32 = arith.constant 0 : i32
    %c0_i32_0 = arith.constant 0 : i32
    %c0_i32_1 = arith.constant 0 : i32
    return %c0_i32, %c0_i32_0 : i32, i32
  }
  func.func @transform_2(%arg0: i32) -> (i32, i32) {
    %c0_i32 = arith.constant 0 : i32
    %c0_i32_0 = arith.constant 0 : i32
    %c0_i32_1 = arith.constant 0 : i32
    return %c0_i32, %c0_i32_0 : i32, i32
  }
  func.func @transform_3(%arg0: i32) -> (i32, i32) {
    %c0_i32 = arith.constant 0 : i32
    %c0_i32_0 = arith.constant 0 : i32
    %c0_i32_1 = arith.constant 0 : i32
    return %c0_i32, %c0_i32_0 : i32, i32
  }
  func.func @transform_4(%arg0: i32) -> (i32, i32) {
    %c0_i32 = arith.constant 0 : i32
    %c0_i32_0 = arith.constant 0 : i32
    return %c0_i32, %arg0 : i32, i32
  }
}

</mosaic_0001>

<bundles_post_ra>
// kernel: tpu_custom_call.1
= control target key start
LH: loop header
LB: loop body
LE: loop exit
PB: predicated region body
PF: predicated region fallthrough
CT: control target
= control target key end

     0   :  { %vm42_vm0 = vcmask 1042432   ;;  %vm284_vm1 = vmmov 1   ;;  %vm35_vm3 = vcmask 89088   ;;  %v285_v6 = vmov 0   ;;  %s362_s0 = inlined_call_operand.vmem [shape: f32[11,8], index: 0, kind: input, shape index: {}]   ;;  %s363_s1 = inlined_call_operand.vmem [shape: f32[11,1], index: 1, kind: input, shape index: {}]   ;;  %s364_s2 = inlined_call_operand.vmem [shape: f32[11,11], index: 2, kind: input, shape index: {}]   ;;  %s365_s3 = inlined_call_operand.<no memory space> [shape: f32[1,1], index: 3, kind: input, shape index: {}]   ;;  %s366_s4 = inlined_call_operand.hbm [shape: f32[1,8], index: 4, kind: output, shape index: {}]  }
   0x1   :  { %v19_v0 = vld [vmem:[%s362_s0] sm:$0xff]  ;;  %v20_v1 = vld [vmem:[%s362_s0 + $0x8] sm:$0x7]  ;;  %vm325_vm2 = vmpackc.low %vm42_vm0, %vm284_vm1  ;;  %259 = vset.pattern.permute.xlu0 %v285_v6 }
   0x2   :  { %v21_v2 = vld [vmem:[%s364_s2] sm:$0xff]  ;;  %v242_v3 = vpack.c.bf16 %v20_v1, %v19_v0 }
   0x3   :  { %v23_v5 = vld [vmem:[%s363_s1] sm:$0xff]  ;;  %232 = vmatprep.mubr.msk.f32.mxu0 %vm35_vm3, %v21_v2 }
   0x4   :  { %10 = vsyncpa [#allocation4], 0  ;;  %244 = vmatprep.subr.msk.bf16.mxu0 %vm325_vm2, %v242_v3  ;;  %27 = vperm.xlu0 %259, %v23_v5   ;;  %v22_v7 = vld [vmem:[%s364_s2 + $0x8] sm:$0x7]  ;;  %v286_v9 = vmov 0.0|0.0   ;;  %vm287_vm4 = vmmov 0   ;;  %v124_v21 = vstv %s365_s3 }
   0x5   :  { %247 = vmatpush3.bf16.msk.msra.mxu0 %vm325_vm2, %v242_v3  ;;  %v24_v8 = vld [vmem:[%s363_s1 + $0x8] sm:$0x7]  ;;  %248 = vmatprep.subr.bf16.mxu1 %v286_v9  ;;  %v288_v10 = vmov 0.0   ;;  %v289_v20 = vmov 1.0   ;;  %s290_s26 = smov [#allocation3]  }
   0x6   :  { %239 = vmatprep.mubr.msk.f32.mxu1 %vm287_vm4, %v288_v10  ;;  %s208_s27 = sshll.u32 %s290_s26, 4  ;;  %s209_s27 = int_to_ptr.vmem [resolvable:$true] %s208_s27 }
   0x7   :  { %s260_s28 = scalar_lea.vmem %s209_s27, 16  ;;  %s264_s29 = scalar_lea.vmem %s209_s27, 32 }
   0x8   :  { %233 = vmatmul.mubr.msk.f32.vlgmr.msra.gmra.mrb[0].mxu0 %vm35_vm3, %v22_v7  ;;  %32 = vperm.xlu0 %259, %v24_v8   ;;  %p261_p0 = scmp.ne.s32.totalorder %s209_s27, %s260_s28  ;;  %p265_p1 = scmp.lt.s32.totalorder %s209_s27, %s209_s27 }
   0x9   :  { %p266_p2 = scmp.lt.s32.totalorder %s264_s29, %s260_s28 }
   0xb   :  { %p267_p3 = por %p266_p2, %p265_p1 }
   0xd   :  { %p268_p4 = pnand %p267_p3, %p261_p0 }
  0x83   :  { %v28_v11 = vpop.permute.xlu0 %27 }
  0x87   :  { %v33_v12 = vpop.permute.xlu0 %32 }
  0xdb   :  { %v234_v13 = vpop.f32.mrb[0].mxu0 }
  0xdc   :  { %v118_v14 = vadd.f32 %v234_v13, %v33_v12  ;;  %v112_v15 = vpop.f32.mrb[1].mxu0 }
  0xdd   :  { %v113_v16 = vadd.f32 %v112_v15, %v28_v11 }
  0xde   :  { %v122_v17 = vmul.f32 %v118_v14, %v20_v1 }
  0xdf   :  { %v121_v18 = vmul.f32 %v113_v16, %v19_v0 }
  0xe1   :  { %v249_v19 = vpack.c.bf16 %v122_v17, %v121_v18 }
  0xe3   :  { %251 = vmatpush3.bf16.msk.msra.mxu1 %vm325_vm2, %v249_v19 }
  0xe6   :  { %240 = vmatmul.mubr.msk.f32.vlgmr.msra.gmra.mrb[0].mxu1 %vm35_vm3, %v289_v20 }
 0x1b9   :  { %v197_v22 = vpop.f32.mrb[0].mxu1 }
 0x1ba   :  { %v198_v23 = vadd.f32 %v197_v22, %v124_v21  ;;  %v241_v24 = vpop.f32.mrb[1].mxu1 }
 0x1bc   :  { %201 = vst [vmem:[#allocation3] sm:$0x1] %v198_v23 }
 0x1bd   :  { %271 = shalt.err (!%p268_p4)
}
 0x1be   :  { %s272_s6 = scalar_lea.hbm %s366_s4, 16 }
 0x1bf   :  { %p273_p5 = scmp.ne.s32.totalorder %s366_s4, %s272_s6  ;;  %p276_p6 = scmp.lt.u32.totalorder %s272_s6, %s366_s4 }
 0x1c1   :  { %p278_p7 = pnand %p276_p6, %p273_p5 }
 0x1c3   :  { %281 = shalt.err (!%p278_p7)
}
 0x1c4   :  { %211 = dma.vmem_to_hbm [thread:$0]  %s209_s27, 16, %s366_s4, [#allocation4]  }
 0x1c5   :  { %282 = dma.done.wait [#allocation4], 16  }
 0x1c6   :  { %283 = vsyncadd [#allocation4], 4294967280 }
 0x1c7   :  { %215 = vsyncpa [#allocation4], 1 }

</bundles_post_ra>
